<compile_context>
chip_gen: v6e
topology: v6e:2x2x1
jax: 0.10.0
libtpu: 0.0.40
codegen_flags: <defaults>
</compile_context>

<pallas_src>
import jax
import jax.numpy as jnp
from jax.experimental import pallas as pl
from jax.experimental.pallas import tpu as pltpu


def sacq_kernel(f_ref, a_ref, w1t_ref, w2t_ref, wq1t_ref, wq2t_ref, aux_ref,
                out_ref):
    # aux columns: 0=b1, 1=b2, 2=bq, 3=wqq, 4=bqq (all f32).
    # Layer 1: two small bf16 matmuls, batch rides the 128-wide lane axis.
    z1 = jnp.maximum(
        jnp.dot(w1t_ref[...], f_ref[...], preferred_element_type=jnp.float32)
        + aux_ref[:, 0:1], 0.0)                                   # (H, TB) f32
    z2 = jnp.maximum(
        jnp.dot(w2t_ref[...], a_ref[...], preferred_element_type=jnp.float32)
        + aux_ref[:, 1:2], 0.0)                                   # (H, TB) f32

    # Q layer: Wq^T @ [z1; z2] split into two HxH matmuls (no concat needed).
    q = jnp.maximum(
        jnp.dot(wq1t_ref[...], z1.astype(jnp.bfloat16),
                preferred_element_type=jnp.float32)
        + jnp.dot(wq2t_ref[...], z2.astype(jnp.bfloat16),
                  preferred_element_type=jnp.float32)
        + aux_ref[:, 2:3], 0.0)                                   # (H, TB) f32

    # Final (H -> 1) projection: VPU broadcast-mul + sublane reduce, then a
    # lane-dense (1, TB) store (no masked per-row writeback).
    out = jnp.sum(q * aux_ref[:, 3:4], axis=0, keepdims=True) + aux_ref[0:1, 4:5]
    out_ref[...] = out.astype(out_ref.dtype)


def sacq_forward(frame, action, params):
    B = frame.shape[0]
    w1t = params["w1t"]      # (H, n_obs)       bf16
    w2t = params["w2t"]      # (H, action_dim)  bf16
    wq1t = params["wq1t"]    # (H, H)           bf16
    wq2t = params["wq2t"]    # (H, H)           bf16
    aux = params["aux"]      # (H, 5)           f32
    H, n_obs = w1t.shape
    act_dim = w2t.shape[1]

    # Batch-on-lane ("transposed") activations; transpose + bf16 cast fuse into
    # a single XLA op each (no concat, no extra f32 HBM round trip).
    f_t = frame.astype(jnp.bfloat16).T      # (n_obs, B)
    a_t = action.astype(jnp.bfloat16).T     # (action_dim, B)

    # Lane-axis (batch) tiling policy:
    #  * B <= 512: one block, block lane dim == full array dim (no 128 constraint)
    #  * 512 < B <= 4096: TB=512 -> >= 2 blocks (v7x megacore), pipelined
    #  * B > 4096: TB=2048 fat blocks to amortize per-step overhead
    if B <= 512:
        TB = B
    elif B <= 4096:
        TB = 512
    else:
        TB = 2048
    grid = (pl.cdiv(B, TB),)

    out_t = pl.pallas_call(
        sacq_kernel,
        out_shape=jax.ShapeDtypeStruct((1, B), jnp.float32),
        grid=grid,
        in_specs=[
            pl.BlockSpec((n_obs, TB), lambda i: (0, i)),    # frame^T: tiled over B
            pl.BlockSpec((act_dim, TB), lambda i: (0, i)),  # action^T: tiled over B
            pl.BlockSpec((H, n_obs), lambda i: (0, 0)),     # W1^T   (VMEM-resident)
            pl.BlockSpec((H, act_dim), lambda i: (0, 0)),   # W2^T
            pl.BlockSpec((H, H), lambda i: (0, 0)),         # Wq^T[:, :H]
            pl.BlockSpec((H, H), lambda i: (0, 0)),         # Wq^T[:, H:]
            pl.BlockSpec((H, 5), lambda i: (0, 0)),         # packed b1/b2/bq/wqq/bqq
        ],
        out_specs=pl.BlockSpec((1, TB), lambda i: (0, i)),  # lane-dense output
        compiler_params=pltpu.CompilerParams(
            dimension_semantics=("parallel",)),
    )(f_t, a_t, w1t, w2t, wq1t, wq2t, aux)

    return out_t.T  # (B, 1), matching the nn.Module output


def init_params(key, n_observations, action_dim, n_hidden):
    """PyTorch nn.Linear-style init (U[-k, k], k = 1/sqrt(fan_in)), repacked into
    the transposed / packed layout consumed by the kernel."""
    def linear(key, fan_in, fan_out):
        kw, kb = jax.random.split(key)
        k = 1.0 / jnp.sqrt(jnp.float32(fan_in))
        w = jax.random.uniform(kw, (fan_in, fan_out), jnp.float32, -k, k)
        b = jax.random.uniform(kb, (fan_out,), jnp.float32, -k, k)
        return w, b

    k1, k2, k3, k4 = jax.random.split(key, 4)
    w1, b1 = linear(k1, n_observations, n_hidden)       # self.linear
    w2, b2 = linear(k2, action_dim, n_hidden)           # self.linear_2
    wq, bq = linear(k3, 2 * n_hidden, n_hidden)         # self.linear_q
    wqq, bqq = linear(k4, n_hidden, 1)                  # self.linear_qq

    H = n_hidden
    aux = jnp.stack(
        [b1, b2, bq, wqq[:, 0], jnp.full((H,), bqq[0], jnp.float32)],
        axis=1)                                         # (H, 5) f32

    return {
        # kernel layout (bf16 MXU operands, f32 aux)
        "w1t": w1.T.astype(jnp.bfloat16),
        "w2t": w2.T.astype(jnp.bfloat16),
        "wq1t": wq[:H, :].T.astype(jnp.bfloat16),
        "wq2t": wq[H:, :].T.astype(jnp.bfloat16),
        "aux": aux,
        # raw f32 params for the pure-JAX reference
        "w1": w1, "b1": b1, "w2": w2, "b2": b2,
        "wq": wq, "bq": bq, "wqq": wqq, "bqq": bqq,
    }


def sacq_reference(frame, action, params):
    zf = jax.nn.relu(frame @ params["w1"] + params["b1"])
    za = jax.nn.relu(action @ params["w2"] + params["b2"])
    q = jax.nn.relu(jnp.concatenate([zf, za], axis=1) @ params["wq"] + params["bq"])
    return q @ params["wqq"] + params["bqq"]


if __name__ == "__main__":
    n_observations, action_dim, n_hidden = 16, 4, 32
    batch = 8

    key = jax.random.PRNGKey(0)
    kf, ka, kp = jax.random.split(key, 3)
    frame = jax.random.normal(kf, (batch, n_observations), jnp.float32)
    action = jax.random.normal(ka, (batch, action_dim), jnp.float32)
    params = init_params(kp, n_observations, action_dim, n_hidden)

    out = jax.block_until_ready(sacq_forward(frame, action, params))
    ref = sacq_reference(frame, action, params)

    assert out.shape == (batch, 1), out.shape
    # bf16 MXU operands (f32 accumulation) -> tolerance loosened per review.
    assert jnp.allclose(out, ref, atol=2e-2, rtol=2e-2), (out, ref)
    print("KERNEL_OK")
</pallas_src>

<mosaic_0001>
module attributes {stable_mosaic.version = 11 : i64} {
  func.func @sacq_kernel(%arg0: i32, %arg1: memref<16x8xbf16, #tpu.memory_space<vmem>>, %arg2: memref<4x8xbf16, #tpu.memory_space<vmem>>, %arg3: memref<32x16xbf16, #tpu.memory_space<vmem>>, %arg4: memref<32x4xbf16, #tpu.memory_space<vmem>>, %arg5: memref<32x32xbf16, #tpu.memory_space<vmem>>, %arg6: memref<32x32xbf16, #tpu.memory_space<vmem>>, %arg7: memref<32x5xf32, #tpu.memory_space<vmem>>, %arg8: memref<1x8xf32, #tpu.memory_space<vmem>>) attributes {dimension_semantics = [#tpu.dimension_semantics<parallel>], iteration_bounds = array<i64: 1>, scalar_prefetch = 0 : i64, scratch_operands = 0 : i64, tpu.core_type = #tpu.core_type<tc>, window_params = [{transform_indices = @transform_0, window_bounds = array<i64: 16, 8>}, {transform_indices = @transform_1, window_bounds = array<i64: 4, 8>}, {pipeline_mode = #tpu.pipeline_mode<synchronous>, transform_indices = @transform_2, window_bounds = array<i64: 32, 16>}, {pipeline_mode = #tpu.pipeline_mode<synchronous>, transform_indices = @transform_3, window_bounds = array<i64: 32, 4>}, {pipeline_mode = #tpu.pipeline_mode<synchronous>, transform_indices = @transform_4, window_bounds = array<i64: 32, 32>}, {pipeline_mode = #tpu.pipeline_mode<synchronous>, transform_indices = @transform_5, window_bounds = array<i64: 32, 32>}, {pipeline_mode = #tpu.pipeline_mode<synchronous>, transform_indices = @transform_6, window_bounds = array<i64: 32, 5>}, {transform_indices = @transform_7, window_bounds = array<i64: 1, 8>}]} {
    %c0 = arith.constant 0 : index
    %c0_0 = arith.constant 0 : index
    %0 = vector.load %arg3[%c0, %c0_0] : memref<32x16xbf16, #tpu.memory_space<vmem>>, vector<32x16xbf16>
    %c0_1 = arith.constant 0 : index
    %c0_2 = arith.constant 0 : index
    %1 = vector.load %arg1[%c0_1, %c0_2] : memref<16x8xbf16, #tpu.memory_space<vmem>>, vector<16x8xbf16>
    %cst = arith.constant dense<0.000000e+00> : vector<32x8xf32>
    %2 = tpu.matmul %0, %1, %cst {dimension_numbers = #tpu.dot_dimension_numbers<[1], [0], [0], [1], [0, 0, 1, 1], [], []>} : vector<32x16xbf16>, vector<16x8xbf16>, vector<32x8xf32> -> vector<32x8xf32>
    %c0_3 = arith.constant 0 : index
    %c0_4 = arith.constant 0 : index
    %3 = vector.load %arg7[%c0_3, %c0_4] : memref<32x5xf32, #tpu.memory_space<vmem>>, vector<32x1xf32>
    %4 = vector.broadcast %3 : vector<32x1xf32> to vector<32x8xf32>
    %5 = arith.addf %2, %4 : vector<32x8xf32>
    %cst_5 = arith.constant 0.000000e+00 : f32
    %6 = vector.broadcast %cst_5 : f32 to vector<32x8xf32>
    %7 = arith.maximumf %5, %6 : vector<32x8xf32>
    %c0_6 = arith.constant 0 : index
    %c0_7 = arith.constant 0 : index
    %8 = vector.load %arg4[%c0_6, %c0_7] : memref<32x4xbf16, #tpu.memory_space<vmem>>, vector<32x4xbf16>
    %c0_8 = arith.constant 0 : index
    %c0_9 = arith.constant 0 : index
    %9 = vector.load %arg2[%c0_8, %c0_9] : memref<4x8xbf16, #tpu.memory_space<vmem>>, vector<4x8xbf16>
    %cst_10 = arith.constant dense<0.000000e+00> : vector<32x8xf32>
    %10 = tpu.matmul %8, %9, %cst_10 {dimension_numbers = #tpu.dot_dimension_numbers<[1], [0], [0], [1], [0, 0, 1, 1], [], []>} : vector<32x4xbf16>, vector<4x8xbf16>, vector<32x8xf32> -> vector<32x8xf32>
    %c0_11 = arith.constant 0 : index
    %c1 = arith.constant 1 : index
    %11 = vector.load %arg7[%c0_11, %c1] : memref<32x5xf32, #tpu.memory_space<vmem>>, vector<32x1xf32>
    %12 = vector.broadcast %11 : vector<32x1xf32> to vector<32x8xf32>
    %13 = arith.addf %10, %12 : vector<32x8xf32>
    %cst_12 = arith.constant 0.000000e+00 : f32
    %14 = vector.broadcast %cst_12 : f32 to vector<32x8xf32>
    %15 = arith.maximumf %13, %14 : vector<32x8xf32>
    %c0_13 = arith.constant 0 : index
    %c0_14 = arith.constant 0 : index
    %16 = vector.load %arg5[%c0_13, %c0_14] : memref<32x32xbf16, #tpu.memory_space<vmem>>, vector<32x32xbf16>
    %17 = arith.truncf %7 : vector<32x8xf32> to vector<32x8xbf16>
    %cst_15 = arith.constant dense<0.000000e+00> : vector<32x8xf32>
    %18 = tpu.matmul %16, %17, %cst_15 {dimension_numbers = #tpu.dot_dimension_numbers<[1], [0], [0], [1], [0, 0, 1, 1], [], []>} : vector<32x32xbf16>, vector<32x8xbf16>, vector<32x8xf32> -> vector<32x8xf32>
    %c0_16 = arith.constant 0 : index
    %c0_17 = arith.constant 0 : index
    %19 = vector.load %arg6[%c0_16, %c0_17] : memref<32x32xbf16, #tpu.memory_space<vmem>>, vector<32x32xbf16>
    %20 = arith.truncf %15 : vector<32x8xf32> to vector<32x8xbf16>
    %cst_18 = arith.constant dense<0.000000e+00> : vector<32x8xf32>
    %21 = tpu.matmul %19, %20, %cst_18 {dimension_numbers = #tpu.dot_dimension_numbers<[1], [0], [0], [1], [0, 0, 1, 1], [], []>} : vector<32x32xbf16>, vector<32x8xbf16>, vector<32x8xf32> -> vector<32x8xf32>
    %22 = arith.addf %18, %21 : vector<32x8xf32>
    %c0_19 = arith.constant 0 : index
    %c2 = arith.constant 2 : index
    %23 = vector.load %arg7[%c0_19, %c2] : memref<32x5xf32, #tpu.memory_space<vmem>>, vector<32x1xf32>
    %24 = vector.broadcast %23 : vector<32x1xf32> to vector<32x8xf32>
    %25 = arith.addf %22, %24 : vector<32x8xf32>
    %cst_20 = arith.constant 0.000000e+00 : f32
    %26 = vector.broadcast %cst_20 : f32 to vector<32x8xf32>
    %27 = arith.maximumf %25, %26 : vector<32x8xf32>
    %c0_21 = arith.constant 0 : index
    %c3 = arith.constant 3 : index
    %28 = vector.load %arg7[%c0_21, %c3] : memref<32x5xf32, #tpu.memory_space<vmem>>, vector<32x1xf32>
    %29 = vector.broadcast %28 : vector<32x1xf32> to vector<32x8xf32>
    %30 = arith.mulf %27, %29 : vector<32x8xf32>
    %cst_22 = arith.constant dense<0.000000e+00> : vector<8xf32>
    %31 = vector.multi_reduction <add>, %30, %cst_22 [0] : vector<32x8xf32> to vector<8xf32>
    %32 = vector.shape_cast %31 : vector<8xf32> to vector<1x8xf32>
    %c0_23 = arith.constant 0 : index
    %c4 = arith.constant 4 : index
    %33 = vector.load %arg7[%c0_23, %c4] : memref<32x5xf32, #tpu.memory_space<vmem>>, vector<1x1xf32>
    %34 = vector.broadcast %33 : vector<1x1xf32> to vector<1x8xf32>
    %35 = arith.addf %32, %34 : vector<1x8xf32>
    %c0_24 = arith.constant 0 : index
    %c0_25 = arith.constant 0 : index
    %36 = vector.load %arg8[%c0_24, %c0_25] : memref<1x8xf32, #tpu.memory_space<vmem>>, vector<1x8xf32>
    tpu.vector_store %arg8[%c0_24, %c0_25], %35 {strides = array<i32>} : memref<1x8xf32, #tpu.memory_space<vmem>>, vector<1x8xf32>,
    return
  }
  func.func @transform_0(%arg0: i32) -> (i32, i32) {
    %c0_i32 = arith.constant 0 : i32
    %c0_i32_0 = arith.constant 0 : i32
    return %c0_i32, %arg0 : i32, i32
  }
  func.func @transform_1(%arg0: i32) -> (i32, i32) {
    %c0_i32 = arith.constant 0 : i32
    %c0_i32_0 = arith.constant 0 : i32
    return %c0_i32, %arg0 : i32, i32
  }
  func.func @transform_2(%arg0: i32) -> (i32, i32) {
    %c0_i32 = arith.constant 0 : i32
    %c0_i32_0 = arith.constant 0 : i32
    %c0_i32_1 = arith.constant 0 : i32
    return %c0_i32, %c0_i32_0 : i32, i32
  }
  func.func @transform_3(%arg0: i32) -> (i32, i32) {
    %c0_i32 = arith.constant 0 : i32
    %c0_i32_0 = arith.constant 0 : i32
    %c0_i32_1 = arith.constant 0 : i32
    return %c0_i32, %c0_i32_0 : i32, i32
  }
  func.func @transform_4(%arg0: i32) -> (i32, i32) {
    %c0_i32 = arith.constant 0 : i32
    %c0_i32_0 = arith.constant 0 : i32
    %c0_i32_1 = arith.constant 0 : i32
    return %c0_i32, %c0_i32_0 : i32, i32
  }
  func.func @transform_5(%arg0: i32) -> (i32, i32) {
    %c0_i32 = arith.constant 0 : i32
    %c0_i32_0 = arith.constant 0 : i32
    %c0_i32_1 = arith.constant 0 : i32
    return %c0_i32, %c0_i32_0 : i32, i32
  }
  func.func @transform_6(%arg0: i32) -> (i32, i32) {
    %c0_i32 = arith.constant 0 : i32
    %c0_i32_0 = arith.constant 0 : i32
    %c0_i32_1 = arith.constant 0 : i32
    return %c0_i32, %c0_i32_0 : i32, i32
  }
  func.func @transform_7(%arg0: i32) -> (i32, i32) {
    %c0_i32 = arith.constant 0 : i32
    %c0_i32_0 = arith.constant 0 : i32
    return %c0_i32, %arg0 : i32, i32
  }
}

</mosaic_0001>

<bundles_post_ra>
// kernel: tpu_custom_call.1
= control target key start
LH: loop header
LB: loop body
LE: loop exit
PB: predicated region body
PF: predicated region fallthrough
CT: control target
= control target key end

     0   :  { %vm172_vm0 = vcmask 1041408   ;;  %vm165_vm1 = vcmask 31744   ;;  %vm74_vm2 = vcmask 130048   ;;  %v561_v8 = vmov 0   ;;  %s659_s0 = inlined_call_operand.vmem [shape: bf16[16,8], index: 0, kind: input, shape index: {}]   ;;  %s660_s1 = inlined_call_operand.vmem [shape: bf16[4,8], index: 1, kind: input, shape index: {}]   ;;  %s661_s2 = inlined_call_operand.vmem [shape: bf16[32,16], index: 2, kind: input, shape index: {}]   ;;  %s662_s3 = inlined_call_operand.vmem [shape: bf16[32,4], index: 3, kind: input, shape index: {}]   ;;  %s663_s4 = inlined_call_operand.vmem [shape: bf16[32,32], index: 4, kind: input, shape index: {}]   ;;  %s664_s5 = inlined_call_operand.vmem [shape: bf16[32,32], index: 5, kind: input, shape index: {}]   ;;  %s665_s6 = inlined_call_operand.vmem [shape: f32[32,5], index: 6, kind: input, shape index: {}]   ;;  %s666_s7 = inlined_call_operand.hbm [shape: f32[1,8], index: 7, kind: output, shape index: {}]  }
   0x1   :  { %v138_v0 = vld [vmem:[%s660_s1] sm:$0x3]  ;;  %v532_v4 = vld [vmem:[%s662_s3 + $0x8] sm:$0xff]   ;;  %v36_v7 = vld [vmem:[%s665_s6 + $0x10] sm:$0xff]  ;;  %519 = vset.pattern.permute.xlu0 %v561_v8  ;;  %v562_v10 = vmov 1  }
   0x2   :  { %v530_v1 = vld [vmem:[%s659_s0] sm:$0xff]   ;;  %512 = vmatprep.subr.msk.bf16.mxu1 %vm172_vm0, %v138_v0  ;;  %v174_v2 = vsel %vm172_vm0, %v138_v0, 0  ;;  %v534_v6 = vld [vmem:[%s661_s2 + $0x8] sm:$0xff]   ;;  %v37_v9 = vld [vmem:[%s665_s6 + $0x18] sm:$0xff]  ;;  %50 = vperm.xlu0 %519, %v36_v7  }
   0x3   :  { %v531_v3 = vld [vmem:[%s662_s3] sm:$0xff]   ;;  %491 = vmatpush3.bf16.msra.mxu1 %v174_v2  ;;  %484 = vmatprep.subr.bf16.mxu0 %v530_v1 }
   0x4   :  { %485 = vmatpush3.bf16.msra.mxu0 %v530_v1  ;;  %492 = vmatprep.mubr.msk.bf16.mxu1 %vm165_vm1, %v531_v3  ;;  %v533_v5 = vld [vmem:[%s661_s2] sm:$0xff]  }
   0x5   :  { %486 = vmatprep.mubr.msk.bf16.mxu0 %vm74_vm2, %v533_v5  ;;  %520 = vset.pattern.permute.xlu1 %v562_v10 }
   0x6   :  { %493 = vmatmul.mubr.msk.bf16.vlgmr.msra.gmra.mxu1 %vm165_vm1, %v532_v4  ;;  %148 = vperm.xlu1 %520, %v36_v7  }
   0x7   :  { %487 = vmatmul.mubr.msk.bf16.vlgmr.msra.gmra.mxu0 %vm74_vm2, %v534_v6 }
   0x8   :  { %12 = vsyncpa [#allocation3], 0  ;;  %55 = vperm.xlu0 %519, %v37_v9   ;;  %v34_v11 = vld [vmem:[%s665_s6] sm:$0xff]  ;;  %v35_v12 = vld [vmem:[%s665_s6 + $0x8] sm:$0xff]  ;;  %vm251_vm3 = vcmask 261120   ;;  %v563_v15 = vmov 2  }
   0x9   :  { %v535_v13 = vld [vmem:[%s664_s5] sm:$0xff]   ;;  %v564_v16 = vmov 3   ;;  %v565_v17 = vmov 4   ;;  %v536_v55 = vld [vmem:[%s664_s5 + $0x8] sm:$0xff]   ;;  %vm416_vm4 = vcmask 64512   ;;  %vm437_vm5 = vcmask 57344  }
   0xa   :  { %152 = vperm.xlu1 %520, %v37_v9   ;;  %500 = vmatprep.mubr.msk.bf16.mxu0 %vm251_vm3, %v535_v13  ;;  %v537_v14 = vld [vmem:[%s663_s4] sm:$0xff]   ;;  %v538_v56 = vld [vmem:[%s663_s4 + $0x8] sm:$0xff]   ;;  %s566_s4 = smov [#allocation2]  }
   0xb   :  { %508 = vmatprep.mubr.msk.bf16.mxu1 %vm251_vm3, %v537_v14  ;;  %v430_v18 = vld [vmem:[%s665_s6] sm:$0x1]  ;;  %s445_s5 = sshll.u32 %s566_s4, 4  ;;  %s446_s5 = int_to_ptr.vmem [resolvable:$true] %s445_s5 }
   0xc   :  { %40 = vperm.xlu0 %519, %v34_v11   ;;  %s539_s26 = scalar_lea.vmem %s446_s5, 16  ;;  %s543_s27 = scalar_lea.vmem %s446_s5, 32 }
   0xd   :  { %p540_p0 = scmp.ne.s32.totalorder %s446_s5, %s539_s26  ;;  %p544_p1 = scmp.lt.s32.totalorder %s446_s5, %s446_s5 }
   0xe   :  { %521 = vset.pattern.permute.xlu1 %v561_v8  ;;  %p545_p2 = scmp.lt.s32.totalorder %s543_s27, %s539_s26 }
   0xf   :  { %45 = vperm.xlu1 %521, %v35_v12  }
  0x10   :  { %522 = vset.pattern.permute.xlu0 %v562_v10  ;;  %p546_p3 = por %p545_p2, %p544_p1 }
  0x11   :  { %140 = vperm.xlu0 %522, %v34_v11  }
  0x12   :  { %p547_p4 = pnand %p546_p3, %p540_p0 }
  0x13   :  { %523 = vset.pattern.permute.xlu1 %v562_v10 }
  0x14   :  { %144 = vperm.xlu1 %523, %v35_v12  }
  0x15   :  { %525 = vset.pattern.permute.xlu0 %v563_v15 }
  0x16   :  { %377 = vperm.xlu0 %525, %v35_v12  }
  0x18   :  { %524 = vset.pattern.permute.xlu1 %v563_v15 }
  0x19   :  { %373 = vperm.xlu1 %524, %v34_v11  }
  0x1a   :  { %526 = vset.pattern.permute.xlu0 %v564_v16 }
  0x1b   :  { %397 = vperm.xlu0 %526, %v34_v11  }
  0x1d   :  { %381 = vperm.xlu1 %524, %v36_v7  }
  0x1f   :  { %409 = vperm.xlu0 %526, %v37_v9  }
  0x21   :  { %385 = vperm.xlu1 %524, %v37_v9  }
  0x23   :  { %529 = vset.pattern.permute.xlu0 %v565_v17 }
  0x25   :  { %527 = vset.pattern.permute.xlu1 %v564_v16 }
  0x26   :  { %401 = vperm.xlu1 %527, %v35_v12  }
  0x2a   :  { %405 = vperm.xlu1 %527, %v36_v7  }
  0x2e   :  { %528 = vset.pattern.permute.xlu1 %v565_v17 }
  0x2f   :  { %433 = vperm.xlu1 %528, %v430_v18  }
  0x7d   :  { %v51_v19 = vpop.permute.xlu0 %50 }
  0x81   :  { %v149_v20 = vpop.permute.xlu1 %148 }
  0x83   :  { %v56_v21 = vpop.permute.xlu0 %55 }
  0x85   :  { %v153_v22 = vpop.permute.xlu1 %152 }
  0x87   :  { %v41_v23 = vpop.permute.xlu0 %40 }
  0x8a   :  { %v46_v24 = vpop.permute.xlu1 %45 }
  0x8c   :  { %v141_v26 = vpop.permute.xlu0 %140 }
  0x8f   :  { %v145_v30 = vpop.permute.xlu1 %144 }
  0x91   :  { %v378_v61 = vpop.permute.xlu0 %377 }
  0x94   :  { %v374_v57 = vpop.permute.xlu1 %373 }
  0x96   :  { %v398_v10 = vpop.permute.xlu0 %397 }
  0x98   :  { %v382_v58 = vpop.permute.xlu1 %381 }
  0x9c   :  { %v386_v59 = vpop.permute.xlu1 %385 }
  0xa1   :  { %v402_v3 = vpop.permute.xlu1 %401 }
  0xa5   :  { %v406_v17 = vpop.permute.xlu1 %405 }
  0xc6   :  { %v494_v25 = vpop.f32.mrf.mxu1 }
  0xc7   :  { %v219_v27 = vadd.f32 %v494_v25, %v149_v20  ;;  %v488_v29 = vpop.f32.mrf.mxu0 }
  0xc8   :  { %v210_v28 = vpop.f32.mrf.mxu1  ;;  %v124_v32 = vadd.f32 %v488_v29, %v51_v19 }
  0xc9   :  { %v211_v31 = vadd.f32 %v210_v28, %v141_v26  ;;  %v115_v33 = vpop.f32.mrf.mxu0  ;;  %v227_v36 = vmax.f32 %v219_v27, 0.0 }
  0xca   :  { %v495_v34 = vpop.f32.mrf.mxu1  ;;  %v116_v39 = vadd.f32 %v115_v33, %v41_v23  ;;  %v132_v44 = vmax.f32 %v124_v32, 0.0 }
  0xcb   :  { %v222_v35 = vadd.f32 %v495_v34, %v153_v22  ;;  %v489_v38 = vpop.f32.mrf.mxu0  ;;  %v225_v43 = vmax.f32 %v211_v31, 0.0 }
  0xcc   :  { %v213_v37 = vpop.f32.mrf.mxu1  ;;  %v127_v42 = vadd.f32 %v489_v38, %v56_v21  ;;  %v130_v50 = vmax.f32 %v116_v39, 0.0  ;;  %v410_v21 = vpop.permute.xlu0 %409 }
  0xcd   :  { %v228_v40 = vmax.f32 %v222_v35, 0.0  ;;  %v214_v41 = vadd.f32 %v213_v37, %v145_v30  ;;  %v118_v45 = vpop.f32.mrf.mxu0  ;;  %v434_v37 = vpop.permute.xlu1 %433 }
  0xce   :  { %v133_v48 = vmax.f32 %v127_v42, 0.0  ;;  %v119_v49 = vadd.f32 %v118_v45, %v46_v24 }
  0xcf   :  { %v240_v46 = vpack.c.bf16 %v228_v40, %v227_v36  ;;  %v226_v47 = vmax.f32 %v214_v41, 0.0 }
  0xd0   :  { %v234_v52 = vpack.c.bf16 %v133_v48, %v132_v44  ;;  %v131_v53 = vmax.f32 %v119_v49, 0.0 }
  0xd1   :  { %v239_v51 = vpack.c.bf16 %v226_v47, %v225_v43  ;;  %496 = vmatprep.subr.bf16.mxu0 %v240_v46 }
  0xd2   :  { %497 = vmatpush3.bf16.msra.mxu0 %v240_v46  ;;  %v233_v54 = vpack.c.bf16 %v131_v53, %v130_v50  ;;  %504 = vmatprep.subr.bf16.mxu1 %v234_v52 }
  0xd3   :  { %498 = vmatprep.subr.bf16.mxu0 %v239_v51  ;;  %505 = vmatpush3.bf16.msra.mxu1 %v234_v52 }
  0xd4   :  { %506 = vmatprep.subr.bf16.mxu1 %v233_v54 }
  0xd6   :  { %499 = vmatpush3.bf16.msra.mxu0 %v239_v51 }
  0xd7   :  { %507 = vmatpush3.bf16.msra.mxu1 %v233_v54 }
  0xd9   :  { %501 = vmatmul.mubr.msk.bf16.vlgmr.msra.gmra.mxu0 %vm251_vm3, %v536_v55 }
  0xda   :  { %509 = vmatmul.mubr.msk.bf16.vlgmr.msra.gmra.mxu1 %vm251_vm3, %v538_v56 }
 0x199   :  { %v502_v60 = vpop.f32.mrf.mxu0 }
 0x19a   :  { %v510_v63 = vpop.f32.mrf.mxu1 }
 0x19b   :  { %v292_v62 = vpop.f32.mrf.mxu0  ;;  %v366_v0 = vadd.f32 %v510_v63, %v502_v60 }
 0x19c   :  { %v357_v2 = vpop.f32.mrf.mxu1 }
 0x19d   :  { %v503_v1 = vpop.f32.mrf.mxu0  ;;  %v358_v4 = vadd.f32 %v357_v2, %v292_v62  ;;  %v390_v7 = vadd.f32 %v382_v58, %v366_v0 }
 0x19e   :  { %v511_v6 = vpop.f32.mrf.mxu1 }
 0x19f   :  { %v295_v5 = vpop.f32.mrf.mxu0  ;;  %v388_v8 = vadd.f32 %v374_v57, %v358_v4  ;;  %v369_v9 = vadd.f32 %v511_v6, %v503_v1  ;;  %v394_v15 = vmax.f32 %v390_v7, 0.0 }
 0x1a0   :  { %v360_v11 = vpop.f32.mrf.mxu1 }
 0x1a1   :  { %v391_v12 = vadd.f32 %v386_v59, %v369_v9  ;;  %v392_v13 = vmax.f32 %v388_v8, 0.0  ;;  %v361_v14 = vadd.f32 %v360_v11, %v295_v5  ;;  %v414_v22 = vmul.f32 %v406_v17, %v394_v15 }
 0x1a3   :  { %v389_v16 = vadd.f32 %v378_v61, %v361_v14  ;;  %v412_v18 = vmul.f32 %v398_v10, %v392_v13  ;;  %v395_v20 = vmax.f32 %v391_v12, 0.0  ;;  %v420_v28 = vsel %vm416_vm4, %v414_v22, 0.0 }
 0x1a5   :  { %v393_v19 = vmax.f32 %v389_v16, 0.0  ;;  %v417_v24 = vsel %vm416_vm4, %v412_v18, 0.0  ;;  %v415_v26 = vmul.f32 %v410_v21, %v395_v20 }
 0x1a7   :  { %v413_v23 = vmul.f32 %v402_v3, %v393_v19  ;;  %v422_v30 = vsel %vm416_vm4, %v415_v26, 0.0 }
 0x1a9   :  { %v418_v25 = vsel %vm416_vm4, %v413_v23, 0.0 }
 0x1aa   :  { %v419_v27 = vadd.f32 %v418_v25, %v417_v24 }
 0x1ac   :  { %v421_v29 = vadd.f32 %v420_v28, %v419_v27 }
 0x1ae   :  { %v423_v31 = vadd.f32 %v422_v30, %v421_v29 }
 0x1b0   :  { %v424_v32 = vrot.slane %v423_v31, 4 }
 0x1b2   :  { %v425_v33 = vadd.f32 %v424_v32, %v423_v31 }
 0x1b4   :  { %v426_v34 = vrot.slane %v425_v33, 2 }
 0x1b6   :  { %v427_v35 = vadd.f32 %v426_v34, %v425_v33 }
 0x1b8   :  { %v428_v36 = vrot.slane %v427_v35, 1 }
 0x1ba   :  { %v429_v38 = vadd.f32 %v428_v36, %v427_v35 }
 0x1bc   :  { %v436_v39 = vadd.f32 %v434_v37, %v429_v38 }
 0x1be   :  { %438 = vst.msk [vmem:[#allocation2] sm:$0x1] %vm437_vm5, %v436_v39 }
 0x1bf   :  { %550 = shalt.err (!%p547_p4)
}
 0x1c0   :  { %448 = dma.vmem_to_hbm [thread:$0]  %s446_s5, 16, %s666_s7, [#allocation3]  }
 0x1c1   :  { %559 = dma.done.wait [#allocation3], 16  }
 0x1c2   :  { %560 = vsyncadd [#allocation3], 4294967280 }
 0x1c3   :  { %452 = vsyncpa [#allocation3], 1 }

</bundles_post_ra>
